<compile_context>
chip_gen: v6e
topology: v6e:2x2x1
jax: 0.10.0
libtpu: 0.0.40
codegen_flags: <defaults>
</compile_context>

<pallas_src>
import jax
import jax.numpy as jnp
from jax.experimental import pallas as pl
from jax.experimental.pallas import tpu as pltpu


def _cdiv(a, b):
    return -(-a // b)


def _round_up(x, m):
    return _cdiv(x, m) * m


def _block_diag(w, p):
    """(In, Out) -> (p*In, p*Out) block-diagonal replication of w."""
    if p == 1:
        return w
    i, o = w.shape
    eye = jnp.eye(p, dtype=w.dtype)
    return jnp.einsum("pq,io->piqo", eye, w).reshape(p * i, p * o)


def _target_lane_width():
    # v6e / v7x MXUs are 2x256^2 -> a K=256 contraction halves MXU pushes.
    # v5e / v5p / v4 keep K=128 (128-wide MXU; K=256 would double passes).
    try:
        kind = jax.devices()[0].device_kind.lower()
    except Exception:
        return 128
    return 256 if ("v6" in kind or "v7" in kind) else 128


def _make_kernel(compute_dtype):
    def kernel(x_ref, w1_ref, b1_ref, w2_ref, b2_ref, o_ref):
        # x_ref : (tm_p, L) packed row tile   w1_ref: (L, L)   b1_ref: (1, L)
        # w2_ref: (L, 2P)   b2_ref: (1, 2P)   o_ref : (tm_p, 2P)
        x = x_ref[...]
        w1 = w1_ref[...]
        if compute_dtype is not None:
            # Optional (e.g. v5e with f32 activations): VPU cast hides under
            # the input DMA and cuts MXU passes; accumulation stays f32.
            x = x.astype(compute_dtype)
            w1 = w1.astype(compute_dtype)
        h = jnp.dot(x, w1, preferred_element_type=jnp.float32) + b1_ref[...]
        h = jnp.maximum(h, 0.0)  # ReLU
        y = jnp.dot(h, w2_ref[...], preferred_element_type=jnp.float32) + b2_ref[...]
        o_ref[...] = y.astype(o_ref.dtype)
    return kernel


def center_predictor(x, w1, b1, w2, b2, *, tm_rows=16384, compute_dtype=None):
    """x: (B, N, E) -> (B, N, 2).  Fused Linear->ReLU->Linear over the last dim."""
    B, N, E = x.shape
    M = B * N
    x_item = jnp.dtype(x.dtype).itemsize
    w_item = jnp.dtype(w1.dtype).itemsize

    # ---- Row packing: P rows of width E side-by-side in one L = P*E lane row.
    l_target = _target_lane_width()
    p_pref = max(1, l_target // E) if E <= l_target else 1
    P = 1
    for p in range(p_pref, 0, -1):
        # P must divide M exactly so the packed reshape is a free bitcast
        # (no jnp.pad copy of the activations).
        if p_pref % p == 0 and M % p == 0:
            P = p
            break
    L = P * E
    M_packed = M // P

    # dtype-aware sublane quantum (8 f32, 16 bf16, 32 int8/fp8)
    sq = 8 * max(1, 4 // max(1, x_item))

    # ---- VMEM budget: double-buffered tiles + f32 intermediates + weights.
    cast_bytes = (jnp.dtype(compute_dtype).itemsize * L) if compute_dtype is not None else 0
    per_row = (2 * L * x_item                  # x tile (double buffered)
               + 4 * L                         # f32 hidden activation
               + cast_bytes                    # in-kernel cast copy of x tile
               + 2 * P * (2 * x_item + 4))     # out tile (double buffered) + f32 y
    weight_bytes = 2 * w_item * (L * L + L + L * 2 * P + 2 * P)
    TILE_TARGET = 20 * 2**20
    room = max(TILE_TARGET - weight_bytes, sq * per_row)
    vmem_cap = max(sq, (room // per_row) // sq * sq)

    # ---- Tile size: as large as possible, but keep >=2 grid steps when M is
    #      big enough so ("parallel",) can shard across v7x's two TensorCores.
    tm_req = max(sq, (max(1, int(tm_rows)) // P) // sq * sq)
    cap2 = _round_up(_cdiv(M_packed, 2), sq)
    tm_p = max(sq, min(tm_req, cap2, vmem_cap))
    if tm_p >= M_packed:
        tm_p = M_packed                      # one full-extent block
        grid = (1,)
    else:
        grid = (_cdiv(M_packed, tm_p),)      # ragged last block is masked

    # ---- Layout plumbing: free row-major reshapes + tiny weight replication.
    x_packed = x.reshape(M_packed, L)
    w1_rep = _block_diag(w1, P)                  # (L, L) block-diagonal
    b1_rep = jnp.tile(b1, P).reshape(1, L)       # (1, L)
    w2_rep = _block_diag(w2, P)                  # (L, 2P) block-diagonal
    b2_rep = jnp.tile(b2, P).reshape(1, 2 * P)   # (1, 2P)

    est = weight_bytes + tm_p * per_row + (1 << 20)
    vmem_limit = int(min(max(16 * 2**20, est * 3 // 2), 32 * 2**20))
    if est > vmem_limit:
        # TODO(synk): for very large E, add a K-tiled grid axis over E with an
        # f32 accumulator (pl.when init/finalize) instead of loading the whole
        # (E,E) W1 block at once, to stay under v7x's 64 MiB physical VMEM.
        vmem_limit = int(min(est * 3 // 2, 100 * 2**20))

    def _const(shape):
        return pl.BlockSpec(shape, lambda i: (0, 0))

    out = pl.pallas_call(
        _make_kernel(compute_dtype),
        out_shape=jax.ShapeDtypeStruct((M_packed, 2 * P), x.dtype),
        grid_spec=pltpu.PrefetchScalarGridSpec(
            num_scalar_prefetch=0,
            grid=grid,
            in_specs=[
                pl.BlockSpec((tm_p, L), lambda i: (i, 0)),   # packed activations
                _const((L, L)),         # W1 (grid-invariant -> fetched once)
                _const((1, L)),         # b1
                _const((L, 2 * P)),     # W2
                _const((1, 2 * P)),     # b2
            ],
            out_specs=pl.BlockSpec((tm_p, 2 * P), lambda i: (i, 0)),
        ),
        compiler_params=pltpu.CompilerParams(
            dimension_semantics=("parallel",),
            vmem_limit_bytes=vmem_limit,
        ),
    )(x_packed, w1_rep, b1_rep, w2_rep, b2_rep)

    # Packed (M_packed, 2P) is bit-identical row-major to (M, 2).
    return out.reshape(B, N, 2)


def init_params(embedding_dim, key):
    """Deterministic synthetic init (PyTorch-Linear-like uniform bounds)."""
    k1, k2, k3, k4 = jax.random.split(key, 4)
    bound = 1.0 / jnp.sqrt(embedding_dim)
    # Stored as (in, out): equivalent to PyTorch's weight.T
    w1 = jax.random.uniform(k1, (embedding_dim, embedding_dim),
                            jnp.float32, -bound, bound)
    b1 = jax.random.uniform(k2, (embedding_dim,), jnp.float32, -bound, bound)
    w2 = jax.random.uniform(k3, (embedding_dim, 2), jnp.float32, -bound, bound)
    b2 = jax.random.uniform(k4, (2,), jnp.float32, -bound, bound)
    return w1, b1, w2, b2


def _reference(x, w1, b1, w2, b2):
    B, N, E = x.shape
    xf = x.reshape(-1, E).astype(jnp.float32)
    y = jnp.maximum(xf @ w1 + b1, 0.0) @ w2 + b2
    return y.reshape(B, N, 2)


if __name__ == "__main__":
    E = 32
    key = jax.random.PRNGKey(0)
    kx, kp, kx2 = jax.random.split(key, 3)
    w1, b1, w2, b2 = init_params(E, kp)

    # Shapes consistent with the module: batch=2, keypoints=8, embedding=32.
    B, N = 2, 8
    x = jax.random.normal(kx, (B, N, E), jnp.float32)
    out = jax.block_until_ready(center_predictor(x, w1, b1, w2, b2))
    ref = _reference(x, w1, b1, w2, b2)
    assert out.shape == (B, N, 2)
    assert jnp.allclose(out, ref, atol=1e-5, rtol=1e-5)

    # Non-tile-aligned row count (M=111, odd): multi-step grid with a ragged
    # (masked) last block, packing disabled, and NO jnp.pad copy.
    B2, N2 = 3, 37
    xb = jax.random.normal(kx2, (B2, N2, E), jnp.float32)
    out2 = jax.block_until_ready(center_predictor(xb, w1, b1, w2, b2, tm_rows=64))
    ref2 = _reference(xb, w1, b1, w2, b2)
    assert out2.shape == (B2, N2, 2)
    assert jnp.allclose(out2, ref2, atol=1e-5, rtol=1e-5)

    # Native bf16 activations from an upstream producer (no wrapper astype).
    xh = x.astype(jnp.bfloat16)
    out3 = jax.block_until_ready(center_predictor(xh, w1, b1, w2, b2))
    ref3 = _reference(xh, w1, b1, w2, b2)
    assert out3.shape == (B, N, 2) and out3.dtype == jnp.bfloat16
    assert jnp.allclose(out3.astype(jnp.float32), ref3, atol=2e-2, rtol=2e-2)

    print("KERNEL_OK")
</pallas_src>

<mosaic_0001>
module attributes {stable_mosaic.version = 11 : i64} {
  func.func @kernel(%arg0: i32, %arg1: memref<4x128xf32, #tpu.memory_space<vmem>>, %arg2: memref<128x128xf32, #tpu.memory_space<vmem>>, %arg3: memref<1x128xf32, #tpu.memory_space<vmem>>, %arg4: memref<128x8xf32, #tpu.memory_space<vmem>>, %arg5: memref<1x8xf32, #tpu.memory_space<vmem>>, %arg6: memref<4x8xf32, #tpu.memory_space<vmem>>) attributes {dimension_semantics = [#tpu.dimension_semantics<parallel>], iteration_bounds = array<i64: 1>, scalar_prefetch = 0 : i64, scratch_operands = 0 : i64, tpu.core_type = #tpu.core_type<tc>, window_params = [{transform_indices = @transform_0, window_bounds = array<i64: 4, 128>}, {pipeline_mode = #tpu.pipeline_mode<synchronous>, transform_indices = @transform_1, window_bounds = array<i64: 128, 128>}, {pipeline_mode = #tpu.pipeline_mode<synchronous>, transform_indices = @transform_2, window_bounds = array<i64: 1, 128>}, {pipeline_mode = #tpu.pipeline_mode<synchronous>, transform_indices = @transform_3, window_bounds = array<i64: 128, 8>}, {pipeline_mode = #tpu.pipeline_mode<synchronous>, transform_indices = @transform_4, window_bounds = array<i64: 1, 8>}, {transform_indices = @transform_5, window_bounds = array<i64: 4, 8>}]} {
    %c0 = arith.constant 0 : index
    %c0_0 = arith.constant 0 : index
    %0 = vector.load %arg1[%c0, %c0_0] : memref<4x128xf32, #tpu.memory_space<vmem>>, vector<4x128xf32>
    %c0_1 = arith.constant 0 : index
    %c0_2 = arith.constant 0 : index
    %1 = vector.load %arg2[%c0_1, %c0_2] : memref<128x128xf32, #tpu.memory_space<vmem>>, vector<128x128xf32>
    %cst = arith.constant dense<0.000000e+00> : vector<4x128xf32>
    %2 = tpu.matmul %0, %1, %cst {dimension_numbers = #tpu.dot_dimension_numbers<[1], [0], [0], [1], [0, 0, 1, 1], [], []>} : vector<4x128xf32>, vector<128x128xf32>, vector<4x128xf32> -> vector<4x128xf32>
    %c0_3 = arith.constant 0 : index
    %c0_4 = arith.constant 0 : index
    %3 = vector.load %arg3[%c0_3, %c0_4] : memref<1x128xf32, #tpu.memory_space<vmem>>, vector<1x128xf32>
    %4 = vector.broadcast %3 : vector<1x128xf32> to vector<4x128xf32>
    %5 = arith.addf %2, %4 : vector<4x128xf32>
    %cst_5 = arith.constant 0.000000e+00 : f32
    %6 = vector.broadcast %cst_5 : f32 to vector<4x128xf32>
    %7 = arith.maximumf %5, %6 : vector<4x128xf32>
    %c0_6 = arith.constant 0 : index
    %c0_7 = arith.constant 0 : index
    %8 = vector.load %arg4[%c0_6, %c0_7] : memref<128x8xf32, #tpu.memory_space<vmem>>, vector<128x8xf32>
    %cst_8 = arith.constant dense<0.000000e+00> : vector<4x8xf32>
    %9 = tpu.matmul %7, %8, %cst_8 {dimension_numbers = #tpu.dot_dimension_numbers<[1], [0], [0], [1], [0, 0, 1, 1], [], []>} : vector<4x128xf32>, vector<128x8xf32>, vector<4x8xf32> -> vector<4x8xf32>
    %c0_9 = arith.constant 0 : index
    %c0_10 = arith.constant 0 : index
    %10 = vector.load %arg5[%c0_9, %c0_10] : memref<1x8xf32, #tpu.memory_space<vmem>>, vector<1x8xf32>
    %11 = vector.broadcast %10 : vector<1x8xf32> to vector<4x8xf32>
    %12 = arith.addf %9, %11 : vector<4x8xf32>
    %c0_11 = arith.constant 0 : index
    %c0_12 = arith.constant 0 : index
    %13 = vector.load %arg6[%c0_11, %c0_12] : memref<4x8xf32, #tpu.memory_space<vmem>>, vector<4x8xf32>
    tpu.vector_store %arg6[%c0_11, %c0_12], %12 {strides = array<i32>} : memref<4x8xf32, #tpu.memory_space<vmem>>, vector<4x8xf32>,
    return
  }
  func.func @transform_0(%arg0: i32) -> (i32, i32) {
    %c0_i32 = arith.constant 0 : i32
    %c0_i32_0 = arith.constant 0 : i32
    return %arg0, %c0_i32 : i32, i32
  }
  func.func @transform_1(%arg0: i32) -> (i32, i32) {
    %c0_i32 = arith.constant 0 : i32
    %c0_i32_0 = arith.constant 0 : i32
    %c0_i32_1 = arith.constant 0 : i32
    return %c0_i32, %c0_i32_0 : i32, i32
  }
  func.func @transform_2(%arg0: i32) -> (i32, i32) {
    %c0_i32 = arith.constant 0 : i32
    %c0_i32_0 = arith.constant 0 : i32
    %c0_i32_1 = arith.constant 0 : i32
    return %c0_i32, %c0_i32_0 : i32, i32
  }
  func.func @transform_3(%arg0: i32) -> (i32, i32) {
    %c0_i32 = arith.constant 0 : i32
    %c0_i32_0 = arith.constant 0 : i32
    %c0_i32_1 = arith.constant 0 : i32
    return %c0_i32, %c0_i32_0 : i32, i32
  }
  func.func @transform_4(%arg0: i32) -> (i32, i32) {
    %c0_i32 = arith.constant 0 : i32
    %c0_i32_0 = arith.constant 0 : i32
    %c0_i32_1 = arith.constant 0 : i32
    return %c0_i32, %c0_i32_0 : i32, i32
  }
  func.func @transform_5(%arg0: i32) -> (i32, i32) {
    %c0_i32 = arith.constant 0 : i32
    %c0_i32_0 = arith.constant 0 : i32
    return %arg0, %c0_i32 : i32, i32
  }
}

</mosaic_0001>

<bundles_post_ra>
// kernel: tpu_custom_call.1
= control target key start
LH: loop header
LB: loop body
LE: loop exit
PB: predicated region body
PF: predicated region fallthrough
CT: control target
= control target key end

     0   :  { %v356_v1 = vmov 0.0   ;;  %vm357_vm0 = vmmov 0   ;;  %s531_s0 = inlined_call_operand.vmem [shape: f32[4,128], index: 0, kind: input, shape index: {}]   ;;  %s532_s1 = inlined_call_operand.vmem [shape: f32[128,128], index: 1, kind: input, shape index: {}]   ;;  %s533_s2 = inlined_call_operand.vmem [shape: f32[1,128], index: 2, kind: input, shape index: {}]   ;;  %s534_s3 = inlined_call_operand.vmem [shape: f32[128,8], index: 3, kind: input, shape index: {}]   ;;  %s535_s4 = inlined_call_operand.vmem [shape: f32[1,8], index: 4, kind: input, shape index: {}]   ;;  %s536_s5 = inlined_call_operand.hbm [shape: f32[4,8], index: 5, kind: output, shape index: {}]  }
   0x1   :  { %v37_v0 = vld [vmem:[%s532_s1 + $0x78] sm:$0xff]  ;;  %261 = vmatprep.subr.mxu0 %v356_v1  ;;  %v36_v2 = vld [vmem:[%s532_s1 + $0x70] sm:$0xff]  ;;  %293 = vmatprep.mubr.msk.f32.mxu0 %vm357_vm0, %v356_v1  ;;  %v35_v3 = vld [vmem:[%s532_s1 + $0x68] sm:$0xff] }
   0x2   :  { %262 = vmatpush3.msra.mxu0 %v37_v0  ;;  %296 = vmatprep.subr.mxu1 %v356_v1  ;;  %v34_v4 = vld [vmem:[%s532_s1 + $0x60] sm:$0xff]  ;;  %v131_v5 = vld [vmem:[%s534_s3 + $0x78] sm:$0xff]  ;;  %v130_v6 = vld [vmem:[%s534_s3 + $0x70] sm:$0xff] }
   0x3   :  { %263 = vmatprep.subr.mxu0 %v356_v1  ;;  %328 = vmatprep.mubr.msk.f32.mxu1 %vm357_vm0, %v356_v1  ;;  %v33_v7 = vld [vmem:[%s532_s1 + $0x58] sm:$0xff]  ;;  %v129_v8 = vld [vmem:[%s534_s3 + $0x68] sm:$0xff]  ;;  %v32_v9 = vld [vmem:[%s532_s1 + $0x50] sm:$0xff] }
   0x4   :  { %264 = vmatpush3.msra.mxu0 %v36_v2  ;;  %297 = vmatpush3.msra.mxu1 %v131_v5  ;;  %v128_v10 = vld [vmem:[%s534_s3 + $0x60] sm:$0xff] }
   0x5   :  { %265 = vmatprep.subr.mxu0 %v356_v1  ;;  %298 = vmatprep.subr.mxu1 %v356_v1 }
   0x6   :  { %266 = vmatpush3.msra.mxu0 %v35_v3  ;;  %299 = vmatpush3.msra.mxu1 %v130_v6 }
   0x7   :  { %267 = vmatprep.subr.mxu0 %v356_v1  ;;  %300 = vmatprep.subr.mxu1 %v356_v1 }
   0x8   :  { %268 = vmatpush3.msra.mxu0 %v34_v4  ;;  %301 = vmatpush3.msra.mxu1 %v129_v8 }
   0x9   :  { %269 = vmatprep.subr.mxu0 %v356_v1 }
   0xa   :  { %270 = vmatpush3.msra.mxu0 %v33_v7 }
   0xb   :  { %10 = vsyncpa [#allocation3], 0  ;;  %271 = vmatprep.subr.mxu0 %v356_v1  ;;  %v31_v11 = vld [vmem:[%s532_s1 + $0x48] sm:$0xff]  ;;  %302 = vmatprep.subr.mxu1 %v356_v1  ;;  %v127_v12 = vld [vmem:[%s534_s3 + $0x58] sm:$0xff]  ;;  %s358_s11 = smov [#allocation2]   ;;  %vm209_vm1 = vcmask 60416  }
   0xc   :  { %272 = vmatpush3.msra.mxu0 %v32_v9  ;;  %303 = vmatpush3.msra.mxu1 %v128_v10  ;;  %v30_v13 = vld [vmem:[%s532_s1 + $0x40] sm:$0xff]  ;;  %v126_v14 = vld [vmem:[%s534_s3 + $0x50] sm:$0xff]  ;;  %v29_v15 = vld [vmem:[%s532_s1 + $0x38] sm:$0xff]  ;;  %s217_s12 = sshll.u32 %s358_s11, 4  ;;  %s218_s12 = int_to_ptr.vmem [resolvable:$true] %s217_s12 }
   0xd   :  { %273 = vmatprep.subr.mxu0 %v356_v1  ;;  %304 = vmatprep.subr.mxu1 %v356_v1  ;;  %v125_v16 = vld [vmem:[%s534_s3 + $0x48] sm:$0xff]  ;;  %v28_v17 = vld [vmem:[%s532_s1 + $0x30] sm:$0xff]  ;;  %v124_v18 = vld [vmem:[%s534_s3 + $0x40] sm:$0xff]  ;;  %p339_p1 = scmp.lt.s32.totalorder %s218_s12, %s218_s12 }
   0xe   :  { %274 = vmatpush3.msra.mxu0 %v31_v11  ;;  %305 = vmatpush3.msra.mxu1 %v127_v12  ;;  %v27_v19 = vld [vmem:[%s532_s1 + $0x28] sm:$0xff]  ;;  %v123_v20 = vld [vmem:[%s534_s3 + $0x38] sm:$0xff]  ;;  %v26_v21 = vld [vmem:[%s532_s1 + $0x20] sm:$0xff] }
   0xf   :  { %275 = vmatprep.subr.mxu0 %v356_v1  ;;  %306 = vmatprep.subr.mxu1 %v356_v1  ;;  %v122_v22 = vld [vmem:[%s534_s3 + $0x30] sm:$0xff]  ;;  %v25_v23 = vld [vmem:[%s532_s1 + $0x18] sm:$0xff]  ;;  %v121_v24 = vld [vmem:[%s534_s3 + $0x28] sm:$0xff] }
  0x10   :  { %276 = vmatpush3.msra.mxu0 %v30_v13  ;;  %307 = vmatpush3.msra.mxu1 %v126_v14  ;;  %v24_v25 = vld [vmem:[%s532_s1 + $0x10] sm:$0xff]  ;;  %v120_v26 = vld [vmem:[%s534_s3 + $0x20] sm:$0xff]  ;;  %v23_v27 = vld [vmem:[%s532_s1 + $0x8] sm:$0xff] }
  0x11   :  { %277 = vmatprep.subr.mxu0 %v356_v1  ;;  %308 = vmatprep.subr.mxu1 %v356_v1  ;;  %v119_v28 = vld [vmem:[%s534_s3 + $0x18] sm:$0xff]  ;;  %v22_v29 = vld [vmem:[%s532_s1] sm:$0xff]  ;;  %v118_v31 = vld [vmem:[%s534_s3 + $0x10] sm:$0xff] }
  0x12   :  { %278 = vmatpush3.msra.mxu0 %v29_v15  ;;  %309 = vmatpush3.msra.mxu1 %v125_v16  ;;  %v21_v30 = vld [vmem:[%s531_s0] sm:$0xf]  ;;  %v117_v32 = vld [vmem:[%s534_s3 + $0x8] sm:$0xff] }
  0x13   :  { %279 = vmatprep.subr.mxu0 %v356_v1  ;;  %310 = vmatprep.subr.mxu1 %v356_v1  ;;  %v116_v33 = vld [vmem:[%s534_s3] sm:$0xff]  ;;  %s334_s3 = scalar_lea.vmem %s218_s12, 64 }
  0x14   :  { %280 = vmatpush3.msra.mxu0 %v28_v17  ;;  %311 = vmatpush3.msra.mxu1 %v124_v18  ;;  %v225_v34 = vld [vmem:[%s533_s2] ss:$0 sm:$0xff]  ;;  %p335_p0 = scmp.ne.s32.totalorder %s218_s12, %s334_s3  ;;  %p340_p2 = scmp.lt.s32.totalorder %s334_s3, %s334_s3 }
  0x15   :  { %281 = vmatprep.subr.mxu0 %v356_v1  ;;  %312 = vmatprep.subr.mxu1 %v356_v1  ;;  %v226_v39 = vld [vmem:[%s535_s4] ss:$0 sm:$0xff] }
  0x16   :  { %282 = vmatpush3.msra.mxu0 %v27_v19  ;;  %313 = vmatpush3.msra.mxu1 %v123_v20  ;;  %p341_p3 = por %p340_p2, %p339_p1 }
  0x17   :  { %283 = vmatprep.subr.mxu0 %v356_v1  ;;  %314 = vmatprep.subr.mxu1 %v356_v1 }
  0x18   :  { %284 = vmatpush3.msra.mxu0 %v26_v21  ;;  %315 = vmatpush3.msra.mxu1 %v122_v22  ;;  %p342_p4 = pnand %p341_p3, %p335_p0 }
  0x19   :  { %285 = vmatprep.subr.mxu0 %v356_v1  ;;  %316 = vmatprep.subr.mxu1 %v356_v1 }
  0x1a   :  { %286 = vmatpush3.msra.mxu0 %v25_v23  ;;  %317 = vmatpush3.msra.mxu1 %v121_v24 }
  0x1b   :  { %287 = vmatprep.subr.mxu0 %v356_v1  ;;  %318 = vmatprep.subr.mxu1 %v356_v1 }
  0x1c   :  { %288 = vmatpush3.msra.mxu0 %v24_v25  ;;  %319 = vmatpush3.msra.mxu1 %v120_v26 }
  0x1d   :  { %289 = vmatprep.subr.mxu0 %v356_v1  ;;  %320 = vmatprep.subr.mxu1 %v356_v1 }
  0x1e   :  { %290 = vmatpush3.msra.mxu0 %v23_v27  ;;  %321 = vmatpush3.msra.mxu1 %v119_v28 }
  0x1f   :  { %291 = vmatprep.subr.mxu0 %v356_v1  ;;  %322 = vmatprep.subr.mxu1 %v356_v1 }
  0x20   :  { %292 = vmatpush3.msra.mxu0 %v22_v29  ;;  %323 = vmatpush3.msra.mxu1 %v118_v31 }
  0x21   :  { %294 = vmatmul.mubr.f32.vlgmr.msra.gmra.mxu0 %v21_v30  ;;  %324 = vmatprep.subr.mxu1 %v356_v1 }
  0x22   :  { %325 = vmatpush3.msra.mxu1 %v117_v32 }
  0x23   :  { %326 = vmatprep.subr.mxu1 %v356_v1 }
  0x24   :  { %327 = vmatpush3.msra.mxu1 %v116_v33 }
  0xe1   :  { %v111_v35 = vpop.f32.mrf.mxu0 }
  0xe2   :  { %v112_v36 = vadd.f32 %v225_v34, %v111_v35 }
  0xe3   :  { %v295_v37 = vpop.f32.mrf.mxu0 }
  0xe4   :  { %v115_v38 = vmax.f32 %v112_v36, 0.0 }
  0xe6   :  { %329 = vmatmul.mubr.f32.vlgmr.msra.gmra.mxu1 %v115_v38 }
 0x1a6   :  { %v205_v40 = vpop.f32.mrf.mxu1 }
 0x1a7   :  { %v206_v41 = vadd.f32 %v226_v39, %v205_v40 }
 0x1a8   :  { %v330_v42 = vpop.f32.mrf.mxu1 }
 0x1a9   :  { %210 = vst.msk [vmem:[#allocation2] sm:$0xf] %vm209_vm1, %v206_v41 }
 0x1aa   :  { %345 = shalt.err (!%p342_p4)
}
 0x1ab   :  { %220 = dma.vmem_to_hbm [thread:$0]  %s218_s12, 64, %s536_s5, [#allocation3]  }
 0x1ac   :  { %354 = dma.done.wait [#allocation3], 64  }
 0x1ad   :  { %355 = vsyncadd [#allocation3], 4294967232 }
 0x1ae   :  { %224 = vsyncpa [#allocation3], 1 }

</bundles_post_ra>
